<compile_context>
chip_gen: v5e
topology: v5e:2x2
jax: 0.10.0
libtpu: 0.0.40
codegen_flags: <defaults>
</compile_context>

<pallas_src>
import jax
import jax.numpy as jnp
from jax.experimental import pallas as pl
from jax.experimental.pallas import tpu as pltpu


def _round_up(n, m):
    return ((n + m - 1) // m) * m


def _combined_kernel(x_ref, w1_ref, b1_ref, w2_ref, b2_ref, w3_ref, b3_ref, o_ref):
    # x_ref: [TM, D] f32 -> cast to bf16 in-kernel (no standalone XLA convert pass).
    x = x_ref[...].astype(jnp.bfloat16)
    # fc1 merged across sub-models: [TM, D] @ [D, M*H1] -> [TM, M*H1]
    h1 = jnp.dot(x, w1_ref[...], preferred_element_type=jnp.float32)
    h1 = jnp.maximum(h1 + b1_ref[...], 0.0)
    # fc2 merged via block-diagonal weights: [TM, M*H1] @ [M*H1, M*H2]
    h2 = jnp.dot(h1.astype(jnp.bfloat16), w2_ref[...],
                 preferred_element_type=jnp.float32)
    h2 = jnp.maximum(h2 + b2_ref[...], 0.0)
    # fc3 merged via block-diagonal weights (f32): [TM, M*H2] @ [M*H2, M] -> [TM, M]
    out = jnp.dot(h2, w3_ref[...], preferred_element_type=jnp.float32) + b3_ref[...]
    o_ref[...] = out.astype(o_ref.dtype)


def pack_params(model_params):
    """Fuse the per-sub-model Linear layers into single wide / block-diagonal mats.
    Done once in the wrapper; everything handed to the kernel is 2-D."""
    M = len(model_params)
    H1, D = model_params[0]["w1"].shape
    H2 = model_params[0]["w2"].shape[0]

    # fc1: concatenate output features -> [D, M*H1] (bf16 for the MXU)
    w1t = jnp.concatenate([p["w1"].T for p in model_params], axis=1).astype(jnp.bfloat16)
    b1 = jnp.concatenate([p["b1"] for p in model_params]).reshape(1, M * H1)

    # fc2: block-diagonal [M*H1, M*H2] (bf16); the off-diagonal zero FLOPs are free
    w2bd = jnp.zeros((M * H1, M * H2), jnp.float32)
    for m, p in enumerate(model_params):
        w2bd = w2bd.at[m * H1:(m + 1) * H1, m * H2:(m + 1) * H2].set(p["w2"].T)
    w2bd = w2bd.astype(jnp.bfloat16)
    b2 = jnp.concatenate([p["b2"] for p in model_params]).reshape(1, M * H2)

    # fc3: block-diagonal [M*H2, M] (f32) -> one tiny dot emits the [TM, M] block
    w3bd = jnp.zeros((M * H2, M), jnp.float32)
    for m, p in enumerate(model_params):
        w3bd = w3bd.at[m * H2:(m + 1) * H2, m].set(p["w3"].reshape(H2))
    b3 = jnp.concatenate([p["b3"].reshape(1) for p in model_params]).reshape(1, M)

    return dict(w1t=w1t, b1=b1, w2bd=w2bd, b2=b2, w3bd=w3bd, b3=b3)


def combined_forward(x, packed, block_rows=2048):
    """x: [B, D] float32.  Returns [B, M] float32
    (== torch.cat([model(x) for model in models], dim=1))."""
    B, D = x.shape
    M = packed["b3"].shape[1]

    # Tile selection: big tiles amortize the ~0.35us/grid-step overhead; cap so
    # large batches get >= 2 grid steps (keeps both v7x TensorCores busy).
    block_rows = max(128, _round_up(block_rows, 128))
    if B >= 256:
        TM = min(block_rows, _round_up(pl.cdiv(B, 2), 128))
    else:
        TM = _round_up(max(B, 1), 16)   # tiny batch: one 16-row-aligned tile

    # Only pad when the batch is smaller than one tile; otherwise the ragged last
    # tile is handled by Pallas' masked out-of-bounds reads/writes (no pad pass).
    xin, B_run = x, B
    if TM > B:
        xin = jnp.pad(x, ((0, TM - B), (0, 0)))
        B_run = TM

    grid = (pl.cdiv(B_run, TM),)

    out = pl.pallas_call(
        _combined_kernel,
        out_shape=jax.ShapeDtypeStruct((B_run, M), jnp.float32),
        grid=grid,
        in_specs=[
            pl.BlockSpec((TM, D), lambda i: (i, 0)),               # streamed x tile
            pl.BlockSpec(packed["w1t"].shape, lambda i: (0, 0)),   # resident weights
            pl.BlockSpec(packed["b1"].shape, lambda i: (0, 0)),
            pl.BlockSpec(packed["w2bd"].shape, lambda i: (0, 0)),
            pl.BlockSpec(packed["b2"].shape, lambda i: (0, 0)),
            pl.BlockSpec(packed["w3bd"].shape, lambda i: (0, 0)),
            pl.BlockSpec(packed["b3"].shape, lambda i: (0, 0)),
        ],
        out_specs=pl.BlockSpec((TM, M), lambda i: (i, 0)),         # [B, M] written directly
        compiler_params=pltpu.CompilerParams(
            dimension_semantics=("parallel",),
            vmem_limit_bytes=32 * 1024 * 1024),
    )(xin, packed["w1t"], packed["b1"], packed["w2bd"], packed["b2"],
      packed["w3bd"], packed["b3"])

    return out[:B] if B_run != B else out


def init_params(key, num_models, input_size, hidden_size=64, hidden2=32):
    """Per-model params in PyTorch nn.Linear layout (W: [out, in], b: [out]),
    U[-1/sqrt(fan_in), 1/sqrt(fan_in)] init."""
    def linear(k, fan_in, fan_out):
        kw, kb = jax.random.split(k)
        bound = 1.0 / jnp.sqrt(fan_in)
        w = jax.random.uniform(kw, (fan_out, fan_in), jnp.float32, -bound, bound)
        b = jax.random.uniform(kb, (fan_out,), jnp.float32, -bound, bound)
        return w, b

    models = []
    for km in jax.random.split(key, num_models):
        k1, k2, k3 = jax.random.split(km, 3)
        w1, b1 = linear(k1, input_size, hidden_size)
        w2, b2 = linear(k2, hidden_size, hidden2)
        w3, b3 = linear(k3, hidden2, 1)
        models.append({"w1": w1, "b1": b1, "w2": w2, "b2": b2, "w3": w3, "b3": b3})
    return models


def _reference(x, model_params):
    """Pure-JAX per-model reference with the same bf16-input / f32-accumulate precision."""
    xb = x.astype(jnp.bfloat16)
    feats = []
    for p in model_params:
        h1 = jnp.maximum(
            jnp.dot(xb, p["w1"].T.astype(jnp.bfloat16),
                    preferred_element_type=jnp.float32) + p["b1"], 0.0)
        h2 = jnp.maximum(
            jnp.dot(h1.astype(jnp.bfloat16), p["w2"].T.astype(jnp.bfloat16),
                    preferred_element_type=jnp.float32) + p["b2"], 0.0)
        feats.append(h2 @ p["w3"].T + p["b3"])                  # [B, 1]
    return jnp.concatenate(feats, axis=1)                       # [B, M]


if __name__ == "__main__":
    key = jax.random.PRNGKey(0)
    kx, kp, kx2 = jax.random.split(key, 3)

    batch, input_size, hidden = 8, 32, 64
    num_models = 3

    x = jax.random.normal(kx, (batch, input_size), jnp.float32)
    model_params = init_params(kp, num_models, input_size, hidden)
    packed = pack_params(model_params)

    # Small batch (single tiny tile).
    out = jax.block_until_ready(combined_forward(x, packed))
    ref = _reference(x, model_params)
    assert out.shape == (batch, num_models), out.shape
    assert jnp.allclose(out, ref, atol=2e-3, rtol=2e-3), "mismatch vs reference (small batch)"

    # Larger batch: multi-step grid + ragged (masked) last tile, no pre-padding.
    x2 = jax.random.normal(kx2, (300, input_size), jnp.float32)
    out2 = jax.block_until_ready(combined_forward(x2, packed))
    ref2 = _reference(x2, model_params)
    assert out2.shape == (300, num_models), out2.shape
    assert jnp.allclose(out2, ref2, atol=2e-3, rtol=2e-3), "mismatch vs reference (large batch)"

    print("KERNEL_OK")
</pallas_src>

<mosaic_0001>
module attributes {stable_mosaic.version = 11 : i64} {
  func.func @_combined_kernel(%arg0: i32, %arg1: memref<16x32xf32, #tpu.memory_space<vmem>>, %arg2: memref<32x192xbf16, #tpu.memory_space<vmem>>, %arg3: memref<1x192xf32, #tpu.memory_space<vmem>>, %arg4: memref<192x96xbf16, #tpu.memory_space<vmem>>, %arg5: memref<1x96xf32, #tpu.memory_space<vmem>>, %arg6: memref<96x3xf32, #tpu.memory_space<vmem>>, %arg7: memref<1x3xf32, #tpu.memory_space<vmem>>, %arg8: memref<16x3xf32, #tpu.memory_space<vmem>>) attributes {dimension_semantics = [#tpu.dimension_semantics<parallel>], iteration_bounds = array<i64: 1>, scalar_prefetch = 0 : i64, scratch_operands = 0 : i64, tpu.core_type = #tpu.core_type<tc>, window_params = [{transform_indices = @transform_0, window_bounds = array<i64: 16, 32>}, {pipeline_mode = #tpu.pipeline_mode<synchronous>, transform_indices = @transform_1, window_bounds = array<i64: 32, 192>}, {pipeline_mode = #tpu.pipeline_mode<synchronous>, transform_indices = @transform_2, window_bounds = array<i64: 1, 192>}, {pipeline_mode = #tpu.pipeline_mode<synchronous>, transform_indices = @transform_3, window_bounds = array<i64: 192, 96>}, {pipeline_mode = #tpu.pipeline_mode<synchronous>, transform_indices = @transform_4, window_bounds = array<i64: 1, 96>}, {pipeline_mode = #tpu.pipeline_mode<synchronous>, transform_indices = @transform_5, window_bounds = array<i64: 96, 3>}, {pipeline_mode = #tpu.pipeline_mode<synchronous>, transform_indices = @transform_6, window_bounds = array<i64: 1, 3>}, {transform_indices = @transform_7, window_bounds = array<i64: 16, 3>}]} {
    %c0 = arith.constant 0 : index
    %c0_0 = arith.constant 0 : index
    %0 = vector.load %arg1[%c0, %c0_0] : memref<16x32xf32, #tpu.memory_space<vmem>>, vector<16x32xf32>
    %1 = arith.truncf %0 : vector<16x32xf32> to vector<16x32xbf16>
    %c0_1 = arith.constant 0 : index
    %c0_2 = arith.constant 0 : index
    %2 = vector.load %arg2[%c0_1, %c0_2] : memref<32x192xbf16, #tpu.memory_space<vmem>>, vector<32x192xbf16>
    %cst = arith.constant dense<0.000000e+00> : vector<16x192xf32>
    %3 = tpu.matmul %1, %2, %cst {dimension_numbers = #tpu.dot_dimension_numbers<[1], [0], [0], [1], [0, 0, 1, 1], [], []>} : vector<16x32xbf16>, vector<32x192xbf16>, vector<16x192xf32> -> vector<16x192xf32>
    %c0_3 = arith.constant 0 : index
    %c0_4 = arith.constant 0 : index
    %4 = vector.load %arg3[%c0_3, %c0_4] : memref<1x192xf32, #tpu.memory_space<vmem>>, vector<1x192xf32>
    %5 = vector.broadcast %4 : vector<1x192xf32> to vector<16x192xf32>
    %6 = arith.addf %3, %5 : vector<16x192xf32>
    %cst_5 = arith.constant 0.000000e+00 : f32
    %7 = vector.broadcast %cst_5 : f32 to vector<16x192xf32>
    %8 = arith.maximumf %6, %7 : vector<16x192xf32>
    %9 = arith.truncf %8 : vector<16x192xf32> to vector<16x192xbf16>
    %c0_6 = arith.constant 0 : index
    %c0_7 = arith.constant 0 : index
    %10 = vector.load %arg4[%c0_6, %c0_7] : memref<192x96xbf16, #tpu.memory_space<vmem>>, vector<192x96xbf16>
    %cst_8 = arith.constant dense<0.000000e+00> : vector<16x96xf32>
    %11 = tpu.matmul %9, %10, %cst_8 {dimension_numbers = #tpu.dot_dimension_numbers<[1], [0], [0], [1], [0, 0, 1, 1], [], []>} : vector<16x192xbf16>, vector<192x96xbf16>, vector<16x96xf32> -> vector<16x96xf32>
    %c0_9 = arith.constant 0 : index
    %c0_10 = arith.constant 0 : index
    %12 = vector.load %arg5[%c0_9, %c0_10] : memref<1x96xf32, #tpu.memory_space<vmem>>, vector<1x96xf32>
    %13 = vector.broadcast %12 : vector<1x96xf32> to vector<16x96xf32>
    %14 = arith.addf %11, %13 : vector<16x96xf32>
    %cst_11 = arith.constant 0.000000e+00 : f32
    %15 = vector.broadcast %cst_11 : f32 to vector<16x96xf32>
    %16 = arith.maximumf %14, %15 : vector<16x96xf32>
    %c0_12 = arith.constant 0 : index
    %c0_13 = arith.constant 0 : index
    %17 = vector.load %arg6[%c0_12, %c0_13] : memref<96x3xf32, #tpu.memory_space<vmem>>, vector<96x3xf32>
    %cst_14 = arith.constant dense<0.000000e+00> : vector<16x3xf32>
    %18 = tpu.matmul %16, %17, %cst_14 {dimension_numbers = #tpu.dot_dimension_numbers<[1], [0], [0], [1], [0, 0, 1, 1], [], []>} : vector<16x96xf32>, vector<96x3xf32>, vector<16x3xf32> -> vector<16x3xf32>
    %c0_15 = arith.constant 0 : index
    %c0_16 = arith.constant 0 : index
    %19 = vector.load %arg7[%c0_15, %c0_16] : memref<1x3xf32, #tpu.memory_space<vmem>>, vector<1x3xf32>
    %20 = vector.broadcast %19 : vector<1x3xf32> to vector<16x3xf32>
    %21 = arith.addf %18, %20 : vector<16x3xf32>
    %c0_17 = arith.constant 0 : index
    %c0_18 = arith.constant 0 : index
    %22 = vector.load %arg8[%c0_17, %c0_18] : memref<16x3xf32, #tpu.memory_space<vmem>>, vector<16x3xf32>
    tpu.vector_store %arg8[%c0_17, %c0_18], %21 {strides = array<i32>} : memref<16x3xf32, #tpu.memory_space<vmem>>, vector<16x3xf32>,
    return
  }
  func.func @transform_0(%arg0: i32) -> (i32, i32) {
    %c0_i32 = arith.constant 0 : i32
    %c0_i32_0 = arith.constant 0 : i32
    return %arg0, %c0_i32 : i32, i32
  }
  func.func @transform_1(%arg0: i32) -> (i32, i32) {
    %c0_i32 = arith.constant 0 : i32
    %c0_i32_0 = arith.constant 0 : i32
    %c0_i32_1 = arith.constant 0 : i32
    return %c0_i32, %c0_i32_0 : i32, i32
  }
  func.func @transform_2(%arg0: i32) -> (i32, i32) {
    %c0_i32 = arith.constant 0 : i32
    %c0_i32_0 = arith.constant 0 : i32
    %c0_i32_1 = arith.constant 0 : i32
    return %c0_i32, %c0_i32_0 : i32, i32
  }
  func.func @transform_3(%arg0: i32) -> (i32, i32) {
    %c0_i32 = arith.constant 0 : i32
    %c0_i32_0 = arith.constant 0 : i32
    %c0_i32_1 = arith.constant 0 : i32
    return %c0_i32, %c0_i32_0 : i32, i32
  }
  func.func @transform_4(%arg0: i32) -> (i32, i32) {
    %c0_i32 = arith.constant 0 : i32
    %c0_i32_0 = arith.constant 0 : i32
    %c0_i32_1 = arith.constant 0 : i32
    return %c0_i32, %c0_i32_0 : i32, i32
  }
  func.func @transform_5(%arg0: i32) -> (i32, i32) {
    %c0_i32 = arith.constant 0 : i32
    %c0_i32_0 = arith.constant 0 : i32
    %c0_i32_1 = arith.constant 0 : i32
    return %c0_i32, %c0_i32_0 : i32, i32
  }
  func.func @transform_6(%arg0: i32) -> (i32, i32) {
    %c0_i32 = arith.constant 0 : i32
    %c0_i32_0 = arith.constant 0 : i32
    %c0_i32_1 = arith.constant 0 : i32
    return %c0_i32, %c0_i32_0 : i32, i32
  }
  func.func @transform_7(%arg0: i32) -> (i32, i32) {
    %c0_i32 = arith.constant 0 : i32
    %c0_i32_0 = arith.constant 0 : i32
    return %arg0, %c0_i32 : i32, i32
  }
}

</mosaic_0001>

<bundles_post_ra>
// kernel: tpu_custom_call.1
= control target key start
LH: loop header
LB: loop body
LE: loop exit
PB: predicated region body
PF: predicated region fallthrough
CT: control target
= control target key end

     0   :  { %12 = vsyncpa [#allocation3], 0  ;;  %s599_s0 = inlined_call_operand.hbm [shape: f32[16,32], index: 0, kind: input, shape index: {}]   ;;  %s600_s1 = inlined_call_operand.hbm [shape: bf16[32,192], index: 1, kind: input, shape index: {}]   ;;  %s601_s2 = inlined_call_operand.vmem [shape: f32[1,192], index: 2, kind: input, shape index: {}]   ;;  %s602_s3 = inlined_call_operand.vmem [shape: bf16[192,96], index: 3, kind: input, shape index: {}]   ;;  %s603_s4 = inlined_call_operand.vmem [shape: f32[1,96], index: 4, kind: input, shape index: {}]   ;;  %s604_s5 = inlined_call_operand.vmem [shape: f32[96,3], index: 5, kind: input, shape index: {}]   ;;  %s605_s6 = inlined_call_operand.vmem [shape: f32[1,3], index: 6, kind: input, shape index: {}]   ;;  %s606_s7 = inlined_call_operand.vmem [shape: f32[16,3], index: 7, kind: output, shape index: {}]  }
   0x1   :  { %s18_s26 = sshll.u32 %s599_s0, 4  ;;  %s19_s26 = int_to_ptr.hbm [resolvable:$true] %s18_s26 }
   0x2   :  { %13 = vsyncpa [#allocation5], 0  ;;  %s462_s27 = smov [#allocation2]   ;;  %s31_s8 = sshll.u32 %s600_s1, 4  ;;  %s32_s8 = int_to_ptr.hbm [resolvable:$true] %s31_s8 }
   0x3   :  { %s20_s28 = sshll.u32 %s462_s27, 4  ;;  %s463_s9 = smov 128   ;;  %s21_s28 = int_to_ptr.vmem [resolvable:$true] %s20_s28 }
   0x4   :  { %s464_s10 = smov 8   ;;  %s465_s11 = smov [#allocation4]  }
   0x5   :  { %26 = dma.hbm_to_vmem [thread:$0]  %s19_s26, 256, %s21_s28, [#allocation3], %s463_s9, %s463_s9, %s464_s10  }
   0x6   :  { %s33_s12 = sshll.u32 %s465_s11, 4  ;;  %s34_s12 = int_to_ptr.vmem [resolvable:$true] %s33_s12 }
   0x7   :  { %39 = dma.hbm_to_vmem [thread:$0]  %s32_s8, 512, %s34_s12, [#allocation5], %s463_s9, %s463_s9, %s464_s10  }
   0x8   :  { %458 = dma.done.wait [#allocation3], 256  }
   0x9   :  { %459 = vsyncadd [#allocation3], 4294967040 }
   0xa   :  { %460 = dma.done.wait [#allocation5], 512  }
   0xb   :  { %461 = vsyncadd [#allocation5], 4294966784  ;;  %v329_v0 = vld [vmem:[#allocation4 + $0x10] sm:$0xf]  ;;  %v391_v1 = vld [vmem:[#allocation4 + $0x14] sm:$0xf0] }
   0xc   :  { %v321_v2 = vld [vmem:[#allocation4] sm:$0xf]  ;;  %v330_v3 = vor.u32 %v391_v1, %v329_v0  ;;  %v389_v4 = vld [vmem:[#allocation4 + $0x4] sm:$0xf0]  ;;  %v390_v5 = vld [vmem:[#allocation4 + $0x14] sm:$0xf] }
   0xd   :  { %v331_v6 = vld [vmem:[#allocation4 + $0x18] sm:$0xf0]  ;;  %v322_v7 = vor.u32 %v389_v4, %v321_v2  ;;  %v59_v8 = vld [vmem:[#allocation2] sm:$0xff]  ;;  %v399_v10 = vld [vmem:[%s602_s3 + $0x38] sm:$0xff]  ;;  %vm92_vm0 = vcmask 261120   ;;  %vm230_vm1 = vcmask 523264  }
   0xe   :  { %102 = vmatpush.bf16.msra.mxu1 %v330_v3  ;;  %v60_v9 = vld [vmem:[#allocation2 + $0x8] sm:$0xff]  ;;  %v334_v11 = vor.u32 %v390_v5, %v331_v6  ;;  %v388_v12 = vld [vmem:[#allocation4 + $0x4] sm:$0xf]  ;;  %v323_v13 = vld [vmem:[#allocation4 + $0x8] sm:$0xf0]  ;;  %234 = vmatpush.bf16.msra.mxu2 %v399_v10  ;;  %vm280_vm2 = vcmask 785408  }
   0xf   :  { %v398_v14 = vld [vmem:[%s602_s3 + $0x30] sm:$0xff]  ;;  %v61_v15 = vpack.c.bf16 %v60_v9, %v59_v8  ;;  %v326_v16 = vor.u32 %v388_v12, %v323_v13  ;;  %v397_v17 = vld [vmem:[%s602_s3 + $0x28] sm:$0xff]  ;;  %v396_v18 = vld [vmem:[%s602_s3 + $0x20] sm:$0xff]  ;;  %vm310_vm3 = vcmask 23552  }
  0x10   :  { %v395_v19 = vld [vmem:[%s602_s3 + $0x18] sm:$0xff]  ;;  %v394_v20 = vld [vmem:[%s602_s3 + $0x10] sm:$0xff]  ;;  %v393_v21 = vld [vmem:[%s602_s3 + $0x8] sm:$0xff] }
  0x11   :  { %v392_v22 = vld [vmem:[%s602_s3] sm:$0xff]  ;;  %v403_v23 = vld [vmem:[%s602_s3 + $0x58] sm:$0xff]  ;;  %v402_v24 = vld [vmem:[%s602_s3 + $0x50] sm:$0xff] }
  0x12   :  { %103 = vmatpush.bf16.msra.mxu1 %v322_v7  ;;  %235 = vmatpush.bf16.msra.mxu2 %v398_v14  ;;  %v401_v25 = vld [vmem:[%s602_s3 + $0x48] sm:$0xff]  ;;  %v400_v26 = vld [vmem:[%s602_s3 + $0x40] sm:$0xff]  ;;  %v275_v27 = vld [vmem:[%s604_s5 + $0x58] sm:$0xff] }
  0x13   :  { %252 = vmatpush.bf16.msra.mxu3 %v403_v23  ;;  %v66_v28 = vld [vmem:[%s601_s2] sm:$0x3]  ;;  %291 = vmatpush.msra.mxu0 %v275_v27  ;;  %v274_v45 = vld [vmem:[%s604_s5 + $0x50] sm:$0xff]  ;;  %v273_v46 = vld [vmem:[%s604_s5 + $0x48] sm:$0xff] }
  0x14   :  { %v68_v30 = vperm.slane %v66_v28, 0  ;;  %v69_v38 = vperm.slane %v66_v28, 1  ;;  %v272_v47 = vld [vmem:[%s604_s5 + $0x40] sm:$0xff]  ;;  %v271_v48 = vld [vmem:[%s604_s5 + $0x38] sm:$0xff]  ;;  %v270_v49 = vld [vmem:[%s604_s5 + $0x30] sm:$0xff] }
  0x15   :  { %335 = vmatmul.msk.bf16.vlgmr.msra.gmra.mxu1 %vm92_vm0, %v61_v15  ;;  %292 = vmatpush.msra.mxu0 %v274_v45  ;;  %v269_v50 = vld [vmem:[%s604_s5 + $0x28] sm:$0xff]  ;;  %v268_v51 = vld [vmem:[%s604_s5 + $0x20] sm:$0xff]  ;;  %v267_v52 = vld [vmem:[%s604_s5 + $0x18] sm:$0xff] }
  0x16   :  { %116 = vmatpush.bf16.msrb.mxu1 %v334_v11  ;;  %236 = vmatpush.bf16.msra.mxu2 %v397_v17  ;;  %v266_v53 = vld [vmem:[%s604_s5 + $0x10] sm:$0xff]  ;;  %v265_v54 = vld [vmem:[%s604_s5 + $0x8] sm:$0xff]  ;;  %v264_v55 = vld [vmem:[%s604_s5] sm:$0xff] }
  0x17   :  { %253 = vmatpush.bf16.msra.mxu3 %v402_v24  ;;  %293 = vmatpush.msra.mxu0 %v273_v46  ;;  %v408_v57 = vld [vmem:[%s603_s4] ss:$0 sm:$0xff] }
  0x18   :  { %v409_v3 = vld [vmem:[%s605_s6] ss:$0 sm:$0xff] }
  0x19   :  { %294 = vmatpush.msra.mxu0 %v272_v47 }
  0x1a   :  { %117 = vmatpush.bf16.msrb.mxu1 %v326_v16  ;;  %237 = vmatpush.bf16.msra.mxu2 %v396_v18 }
  0x1b   :  { %254 = vmatpush.bf16.msra.mxu3 %v401_v25  ;;  %295 = vmatpush.msra.mxu0 %v271_v48 }
  0x1d   :  { %296 = vmatpush.msra.mxu0 %v270_v49 }
  0x1e   :  { %238 = vmatpush.bf16.msra.mxu2 %v395_v19 }
  0x1f   :  { %255 = vmatpush.bf16.msra.mxu3 %v400_v26  ;;  %297 = vmatpush.msra.mxu0 %v269_v50 }
  0x21   :  { %298 = vmatpush.msra.mxu0 %v268_v51 }
  0x22   :  { %239 = vmatpush.bf16.msra.mxu2 %v394_v20 }
  0x23   :  { %299 = vmatpush.msra.mxu0 %v267_v52 }
  0x25   :  { %336 = vmatmul.msk.bf16.vlgmr.msrb.gmra.mxu1 %vm92_vm0, %v61_v15  ;;  %300 = vmatpush.msra.mxu0 %v266_v53 }
  0x26   :  { %240 = vmatpush.bf16.msra.mxu2 %v393_v21 }
  0x27   :  { %301 = vmatpush.msra.mxu0 %v265_v54 }
  0x29   :  { %302 = vmatpush.msra.mxu0 %v264_v55 }
  0x2a   :  { %241 = vmatpush.bf16.msra.mxu2 %v392_v22 }
  0x92   :  { %v105_v29 = vpop.f32.mrf.mxu1 }
  0x93   :  { %v106_v31 = vadd.f32 %v105_v29, %v68_v30 }
  0x95   :  { %v124_v34 = vmax.f32 %v106_v31, 0.0 }
  0x9a   :  { %v107_v32 = vpop.f32.mrf.mxu1 }
  0x9b   :  { %v108_v33 = vadd.f32 %v107_v32, %v68_v30 }
  0x9d   :  { %v126_v35 = vmax.f32 %v108_v33, 0.0 }
  0x9f   :  { %v128_v36 = vpack.c.bf16 %v126_v35, %v124_v34 }
  0xa1   :  { %242 = vmatmul.bf16.vlgmr.msra.gmra.mxu2 %v128_v36 }
  0xa2   :  { %v119_v37 = vpop.f32.mrf.mxu1 }
  0xa3   :  { %v120_v39 = vadd.f32 %v119_v37, %v69_v38 }
  0xa5   :  { %v125_v42 = vmax.f32 %v120_v39, 0.0 }
  0xaa   :  { %v121_v40 = vpop.f32.mrf.mxu1 }
  0xab   :  { %v122_v41 = vadd.f32 %v121_v40, %v69_v38 }
  0xad   :  { %v127_v43 = vmax.f32 %v122_v41, 0.0 }
  0xaf   :  { %v129_v44 = vpack.c.bf16 %v127_v43, %v125_v42 }
  0xb1   :  { %385 = vmatmul.msk.bf16.vlgmr.msra.gmra.mxu3 %vm230_vm1, %v129_v44 }
 0x124   :  { %v243_v56 = vpop.f32.mrf.mxu2 }
 0x125   :  { %v244_v58 = vadd.f32 %v408_v57, %v243_v56 }
 0x12c   :  { %v245_v62 = vpop.f32.mrf.mxu2 }
 0x12d   :  { %v246_v63 = vadd.f32 %v408_v57, %v245_v62 }
 0x134   :  { %v257_v59 = vpop.f32.mrf.mxu3 }
 0x135   :  { %v258_v60 = vadd.f32 %v257_v59, %v244_v58 }
 0x137   :  { %v262_v61 = vmax.f32 %v258_v60, 0.0 }
 0x139   :  { %386 = vmatmul.msk.f32.vlgmr.msra.gmra.mxu0 %vm280_vm2, %v262_v61 }
 0x13c   :  { %v259_v0 = vpop.f32.mrf.mxu3 }
 0x13d   :  { %v260_v1 = vadd.f32 %v259_v0, %v246_v63 }
 0x13f   :  { %v263_v2 = vmax.f32 %v260_v1, 0.0 }
 0x141   :  { %387 = vmatmul.msk.f32.gmra.mxu0 %vm280_vm2, %v263_v2 }
 0x1b6   :  { %v304_v4 = vpop.f32.mrf.mxu0 }
 0x1b7   :  { %v305_v5 = vadd.f32 %v409_v3, %v304_v4 }
 0x1b9   :  { %311 = vst.msk [vmem:[%s606_s7] sm:$0xff] %vm310_vm3, %v305_v5 }
 0x1be   :  { %v307_v6 = vpop.f32.mrf.mxu0 }
 0x1bf   :  { %v308_v7 = vadd.f32 %v409_v3, %v307_v6 }
 0x1c1   :  { %312 = vst.msk [vmem:[%s606_s7 + $0x8] sm:$0xff] %vm310_vm3, %v308_v7 }
 0x1c2   :  { %317 = vsyncpa [#allocation3], 1 }
 0x1c3   :  { %318 = vsyncpa [#allocation5], 1 }

</bundles_post_ra>
